<compile_context>
chip_gen: v5e
topology: v5e:2x2
jax: 0.10.0
libtpu: 0.0.40
codegen_flags: <defaults>
</compile_context>

<pallas_src>
import jax
import jax.numpy as jnp
from jax.experimental import pallas as pl
from jax.experimental.pallas import tpu as pltpu


def lstm_kernel(x_ref, wih_ref, whh_ref, b_ref, wfc_ref, bfc_ref, y_ref, xp_ref):
    # x_ref   : (S*B, I)  bf16, time-major, batch padded to a sublane multiple
    # wih_ref : (I, 4H)   bf16, W_ih^T, PyTorch gate order (i, f, g, o)
    # whh_ref : (H, 4H)   bf16, W_hh^T
    # b_ref   : (1, 4H)   f32,  b_ih + b_hh
    # wfc_ref : (1, H)    f32,  FC head weight row
    # bfc_ref : (1, 1)    f32,  FC head bias (SMEM scalar)
    # y_ref   : (B, 1)    f32
    # xp_ref  : (S*B, 4H) f32 VMEM scratch (hoisted input projection)
    SB = x_ref.shape[0]
    H = whh_ref.shape[0]
    B = y_ref.shape[0]
    S = SB // B

    # Hoisted input projection for all timesteps: one native bf16 MXU pass,
    # off the serial critical path.  Stored to VMEM scratch so the unrolled
    # recurrence only keeps one (B, 4H) tile live per step.
    xp_ref[...] = (
        jnp.dot(x_ref[...], wih_ref[...], preferred_element_type=jnp.float32)
        + b_ref[...])

    whh = whh_ref[...]                                   # (H, 4H) bf16, loop-invariant RHS
    h = jnp.zeros((B, H), jnp.float32)
    c = jnp.zeros((B, H), jnp.float32)

    # Fully unrolled recurrence (S small & static); only h @ W_hh^T is
    # serially dependent.  Slices xp_ref[t*B:(t+1)*B] are sublane-aligned
    # (B % 8 == 0).  For large S, switch to lax.fori_loop(..., unroll=4..8).
    for t in range(S):
        gates = xp_ref[t * B:(t + 1) * B, :] + jnp.dot(
            h.astype(jnp.bfloat16), whh,
            preferred_element_type=jnp.float32)           # (B, 4H) f32
        # Full-width activations: 2 EUP passes over the whole (8,128) vreg
        # instead of four narrow (8,32) passes.
        sig = jax.nn.sigmoid(gates)
        tnh = jnp.tanh(gates)
        i_g = sig[:, 0 * H:1 * H]
        f_g = sig[:, 1 * H:2 * H]
        g_g = tnh[:, 2 * H:3 * H]
        o_g = sig[:, 3 * H:4 * H]
        c = f_g * c + i_g * g_g
        h = o_g * jnp.tanh(c)

    # FC head Linear(H, 1): VPU multiply + lane reduction instead of a
    # 1-column MXU matmul / masked-store tail.
    y = jnp.sum(h * wfc_ref[...], axis=-1, keepdims=True) + bfc_ref[0, 0]
    y_ref[...] = y.astype(y_ref.dtype)


def lstm_forward(windows_bsi, w_ih_t, w_hh_t, bias, w_fc_row, b_fc):
    """windows_bsi: (B, S, I). Returns (B, 1) prediction."""
    B, S, I = windows_bsi.shape
    H = w_hh_t.shape[0]
    B_pad = ((B + 7) // 8) * 8                           # fill sublanes

    x = jnp.transpose(windows_bsi, (1, 0, 2)).astype(jnp.float32)   # (S, B, I)
    if B_pad != B:
        x = jnp.pad(x, ((0, 0), (0, B_pad - B), (0, 0)))
    x = x.reshape(S * B_pad, I).astype(jnp.bfloat16)     # bf16 MXU operand

    y = pl.pallas_call(
        lstm_kernel,
        out_shape=jax.ShapeDtypeStruct((B_pad, 1), jnp.float32),
        in_specs=[
            pl.BlockSpec(memory_space=pltpu.MemorySpace.VMEM),   # x (all steps)
            pl.BlockSpec(memory_space=pltpu.MemorySpace.VMEM),   # W_ih^T (bf16)
            pl.BlockSpec(memory_space=pltpu.MemorySpace.VMEM),   # W_hh^T (bf16)
            pl.BlockSpec(memory_space=pltpu.MemorySpace.VMEM),   # fused bias
            pl.BlockSpec(memory_space=pltpu.MemorySpace.VMEM),   # W_fc row
            pl.BlockSpec(memory_space=pltpu.MemorySpace.SMEM),   # b_fc scalar
        ],
        out_specs=pl.BlockSpec(memory_space=pltpu.MemorySpace.VMEM),
        scratch_shapes=[pltpu.VMEM((S * B_pad, 4 * H), jnp.float32)],  # xp
    )(x,
      w_ih_t.astype(jnp.bfloat16),
      w_hh_t.astype(jnp.bfloat16),
      bias, w_fc_row, b_fc)
    return y[:B]


@jax.jit
def model_forward(windows_bsi, params):
    """Mirrors Model.forward: windows (batch, seq, input) -> (batch, 1)."""
    return lstm_forward(windows_bsi, *params)


def reference_forward(windows_bsi, params):
    """Pure-JAX f32 reference of the same LSTM forward (correctness check)."""
    w_ih_t, w_hh_t, bias, w_fc_row, b_fc = params
    x = jnp.transpose(windows_bsi, (1, 0, 2)).astype(jnp.float32)   # (S, B, I)
    S, B, _ = x.shape
    H = w_hh_t.shape[0]
    h = jnp.zeros((B, H), jnp.float32)
    c = jnp.zeros((B, H), jnp.float32)
    for t in range(S):
        g = x[t] @ w_ih_t + h @ w_hh_t + bias
        i_g = jax.nn.sigmoid(g[:, 0 * H:1 * H])
        f_g = jax.nn.sigmoid(g[:, 1 * H:2 * H])
        g_g = jnp.tanh(g[:, 2 * H:3 * H])
        o_g = jax.nn.sigmoid(g[:, 3 * H:4 * H])
        c = f_g * c + i_g * g_g
        h = o_g * jnp.tanh(c)
    return h @ w_fc_row.T + b_fc[0, 0]


def init_params(key, input_size, hidden_size):
    k1, k2, k3, k4, k5, k6 = jax.random.split(key, 6)
    scale = 1.0 / jnp.sqrt(hidden_size)
    # PyTorch LSTM weights: W_ih (4H, I), W_hh (4H, H); stored transposed here.
    w_ih_t = jax.random.uniform(k1, (input_size, 4 * hidden_size),
                                minval=-scale, maxval=scale, dtype=jnp.float32)
    w_hh_t = jax.random.uniform(k2, (hidden_size, 4 * hidden_size),
                                minval=-scale, maxval=scale, dtype=jnp.float32)
    b_ih = jax.random.uniform(k3, (4 * hidden_size,),
                              minval=-scale, maxval=scale, dtype=jnp.float32)
    b_hh = jax.random.uniform(k4, (4 * hidden_size,),
                              minval=-scale, maxval=scale, dtype=jnp.float32)
    bias = (b_ih + b_hh).reshape(1, 4 * hidden_size)
    # prediction head Linear(hidden, 1), stored as a (1, H) row for VPU reduce
    w_fc_row = jax.random.uniform(k5, (1, hidden_size),
                                  minval=-scale, maxval=scale, dtype=jnp.float32)
    b_fc = jax.random.uniform(k6, (1, 1),
                              minval=-scale, maxval=scale, dtype=jnp.float32)
    return w_ih_t, w_hh_t, bias, w_fc_row, b_fc


if __name__ == "__main__":
    B, S, I, H = 2, 8, 4, 32        # batch, seq (window), input_size, args.dimension
    key = jax.random.PRNGKey(0)
    kx, kp = jax.random.split(key)
    windows = jax.random.normal(kx, (B, S, I), dtype=jnp.float32)
    params = init_params(kp, I, H)

    y = model_forward(windows, params)
    jax.block_until_ready(y)
    assert y.shape == (B, 1) and y.dtype == jnp.float32

    # Tolerance accounts for the bf16 MXU operands vs the all-f32 reference.
    y_ref = reference_forward(windows, params)
    assert jnp.allclose(y, y_ref, rtol=2e-2, atol=2e-2)
    print("KERNEL_OK")
</pallas_src>

<mosaic_0001>
module attributes {stable_mosaic.version = 11 : i64} {
  func.func @lstm_kernel(%arg0: memref<64x4xbf16, #tpu.memory_space<vmem>>, %arg1: memref<4x128xbf16, #tpu.memory_space<vmem>>, %arg2: memref<32x128xbf16, #tpu.memory_space<vmem>>, %arg3: memref<1x128xf32, #tpu.memory_space<vmem>>, %arg4: memref<1x32xf32, #tpu.memory_space<vmem>>, %arg5: memref<1x1xf32, #tpu.memory_space<smem>>, %arg6: memref<8x1xf32, #tpu.memory_space<vmem>>, %arg7: memref<64x128xf32, #tpu.memory_space<vmem>>) attributes {dimension_semantics = [], scalar_prefetch = 0 : i64, scratch_operands = 1 : i64, tpu.core_type = #tpu.core_type<tc>} {
    %c0 = arith.constant 0 : index
    %c0_0 = arith.constant 0 : index
    %0 = vector.load %arg0[%c0, %c0_0] : memref<64x4xbf16, #tpu.memory_space<vmem>>, vector<64x4xbf16>
    %c0_1 = arith.constant 0 : index
    %c0_2 = arith.constant 0 : index
    %1 = vector.load %arg1[%c0_1, %c0_2] : memref<4x128xbf16, #tpu.memory_space<vmem>>, vector<4x128xbf16>
    %cst = arith.constant dense<0.000000e+00> : vector<64x128xf32>
    %2 = tpu.matmul %0, %1, %cst {dimension_numbers = #tpu.dot_dimension_numbers<[1], [0], [0], [1], [0, 0, 1, 1], [], []>} : vector<64x4xbf16>, vector<4x128xbf16>, vector<64x128xf32> -> vector<64x128xf32>
    %c0_3 = arith.constant 0 : index
    %c0_4 = arith.constant 0 : index
    %3 = vector.load %arg3[%c0_3, %c0_4] : memref<1x128xf32, #tpu.memory_space<vmem>>, vector<1x128xf32>
    %4 = vector.broadcast %3 : vector<1x128xf32> to vector<64x128xf32>
    %5 = arith.addf %2, %4 : vector<64x128xf32>
    %c0_5 = arith.constant 0 : index
    %c0_6 = arith.constant 0 : index
    %6 = vector.load %arg7[%c0_5, %c0_6] : memref<64x128xf32, #tpu.memory_space<vmem>>, vector<64x128xf32>
    tpu.vector_store %arg7[%c0_5, %c0_6], %5 {strides = array<i32>} : memref<64x128xf32, #tpu.memory_space<vmem>>, vector<64x128xf32>,
    %c0_7 = arith.constant 0 : index
    %c0_8 = arith.constant 0 : index
    %7 = vector.load %arg2[%c0_7, %c0_8] : memref<32x128xbf16, #tpu.memory_space<vmem>>, vector<32x128xbf16>
    %cst_9 = arith.constant 0.000000e+00 : f32
    %8 = vector.broadcast %cst_9 : f32 to vector<8x32xf32>
    %cst_10 = arith.constant 0.000000e+00 : f32
    %9 = vector.broadcast %cst_10 : f32 to vector<8x32xf32>
    %c0_11 = arith.constant 0 : index
    %c0_12 = arith.constant 0 : index
    %10 = vector.load %arg7[%c0_11, %c0_12] : memref<64x128xf32, #tpu.memory_space<vmem>>, vector<8x128xf32>
    %11 = arith.truncf %8 : vector<8x32xf32> to vector<8x32xbf16>
    %cst_13 = arith.constant dense<0.000000e+00> : vector<8x128xf32>
    %12 = tpu.matmul %11, %7, %cst_13 {dimension_numbers = #tpu.dot_dimension_numbers<[1], [0], [0], [1], [0, 0, 1, 1], [], []>} : vector<8x32xbf16>, vector<32x128xbf16>, vector<8x128xf32> -> vector<8x128xf32>
    %13 = arith.addf %10, %12 : vector<8x128xf32>
    %14 = arith.negf %13 : vector<8x128xf32>
    %15 = math.exp %14 : vector<8x128xf32>
    %cst_14 = arith.constant 1.000000e+00 : f32
    %16 = vector.broadcast %cst_14 : f32 to vector<8x128xf32>
    %17 = arith.addf %16, %15 : vector<8x128xf32>
    %18 = arith.divf %16, %17 : vector<8x128xf32>
    %19 = math.tanh %13 : vector<8x128xf32>
    %20 = vector.extract_strided_slice %18 {offsets = [0, 0], sizes = [8, 32], strides = [1, 1]} : vector<8x128xf32> to vector<8x32xf32>
    %21 = vector.extract_strided_slice %18 {offsets = [0, 32], sizes = [8, 32], strides = [1, 1]} : vector<8x128xf32> to vector<8x32xf32>
    %22 = vector.extract_strided_slice %19 {offsets = [0, 64], sizes = [8, 32], strides = [1, 1]} : vector<8x128xf32> to vector<8x32xf32>
    %23 = vector.extract_strided_slice %18 {offsets = [0, 96], sizes = [8, 32], strides = [1, 1]} : vector<8x128xf32> to vector<8x32xf32>
    %24 = arith.mulf %21, %9 : vector<8x32xf32>
    %25 = arith.mulf %20, %22 : vector<8x32xf32>
    %26 = arith.addf %24, %25 : vector<8x32xf32>
    %27 = math.tanh %26 : vector<8x32xf32>
    %28 = arith.mulf %23, %27 : vector<8x32xf32>
    %c8 = arith.constant 8 : index
    %c0_15 = arith.constant 0 : index
    %29 = vector.load %arg7[%c8, %c0_15] : memref<64x128xf32, #tpu.memory_space<vmem>>, vector<8x128xf32>
    %30 = arith.truncf %28 : vector<8x32xf32> to vector<8x32xbf16>
    %cst_16 = arith.constant dense<0.000000e+00> : vector<8x128xf32>
    %31 = tpu.matmul %30, %7, %cst_16 {dimension_numbers = #tpu.dot_dimension_numbers<[1], [0], [0], [1], [0, 0, 1, 1], [], []>} : vector<8x32xbf16>, vector<32x128xbf16>, vector<8x128xf32> -> vector<8x128xf32>
    %32 = arith.addf %29, %31 : vector<8x128xf32>
    %33 = arith.negf %32 : vector<8x128xf32>
    %34 = math.exp %33 : vector<8x128xf32>
    %cst_17 = arith.constant 1.000000e+00 : f32
    %35 = vector.broadcast %cst_17 : f32 to vector<8x128xf32>
    %36 = arith.addf %35, %34 : vector<8x128xf32>
    %37 = arith.divf %35, %36 : vector<8x128xf32>
    %38 = math.tanh %32 : vector<8x128xf32>
    %39 = vector.extract_strided_slice %37 {offsets = [0, 0], sizes = [8, 32], strides = [1, 1]} : vector<8x128xf32> to vector<8x32xf32>
    %40 = vector.extract_strided_slice %37 {offsets = [0, 32], sizes = [8, 32], strides = [1, 1]} : vector<8x128xf32> to vector<8x32xf32>
    %41 = vector.extract_strided_slice %38 {offsets = [0, 64], sizes = [8, 32], strides = [1, 1]} : vector<8x128xf32> to vector<8x32xf32>
    %42 = vector.extract_strided_slice %37 {offsets = [0, 96], sizes = [8, 32], strides = [1, 1]} : vector<8x128xf32> to vector<8x32xf32>
    %43 = arith.mulf %40, %26 : vector<8x32xf32>
    %44 = arith.mulf %39, %41 : vector<8x32xf32>
    %45 = arith.addf %43, %44 : vector<8x32xf32>
    %46 = math.tanh %45 : vector<8x32xf32>
    %47 = arith.mulf %42, %46 : vector<8x32xf32>
    %c16 = arith.constant 16 : index
    %c0_18 = arith.constant 0 : index
    %48 = vector.load %arg7[%c16, %c0_18] : memref<64x128xf32, #tpu.memory_space<vmem>>, vector<8x128xf32>
    %49 = arith.truncf %47 : vector<8x32xf32> to vector<8x32xbf16>
    %cst_19 = arith.constant dense<0.000000e+00> : vector<8x128xf32>
    %50 = tpu.matmul %49, %7, %cst_19 {dimension_numbers = #tpu.dot_dimension_numbers<[1], [0], [0], [1], [0, 0, 1, 1], [], []>} : vector<8x32xbf16>, vector<32x128xbf16>, vector<8x128xf32> -> vector<8x128xf32>
    %51 = arith.addf %48, %50 : vector<8x128xf32>
    %52 = arith.negf %51 : vector<8x128xf32>
    %53 = math.exp %52 : vector<8x128xf32>
    %cst_20 = arith.constant 1.000000e+00 : f32
    %54 = vector.broadcast %cst_20 : f32 to vector<8x128xf32>
    %55 = arith.addf %54, %53 : vector<8x128xf32>
    %56 = arith.divf %54, %55 : vector<8x128xf32>
    %57 = math.tanh %51 : vector<8x128xf32>
    %58 = vector.extract_strided_slice %56 {offsets = [0, 0], sizes = [8, 32], strides = [1, 1]} : vector<8x128xf32> to vector<8x32xf32>
    %59 = vector.extract_strided_slice %56 {offsets = [0, 32], sizes = [8, 32], strides = [1, 1]} : vector<8x128xf32> to vector<8x32xf32>
    %60 = vector.extract_strided_slice %57 {offsets = [0, 64], sizes = [8, 32], strides = [1, 1]} : vector<8x128xf32> to vector<8x32xf32>
    %61 = vector.extract_strided_slice %56 {offsets = [0, 96], sizes = [8, 32], strides = [1, 1]} : vector<8x128xf32> to vector<8x32xf32>
    %62 = arith.mulf %59, %45 : vector<8x32xf32>
    %63 = arith.mulf %58, %60 : vector<8x32xf32>
    %64 = arith.addf %62, %63 : vector<8x32xf32>
    %65 = math.tanh %64 : vector<8x32xf32>
    %66 = arith.mulf %61, %65 : vector<8x32xf32>
    %c24 = arith.constant 24 : index
    %c0_21 = arith.constant 0 : index
    %67 = vector.load %arg7[%c24, %c0_21] : memref<64x128xf32, #tpu.memory_space<vmem>>, vector<8x128xf32>
    %68 = arith.truncf %66 : vector<8x32xf32> to vector<8x32xbf16>
    %cst_22 = arith.constant dense<0.000000e+00> : vector<8x128xf32>
    %69 = tpu.matmul %68, %7, %cst_22 {dimension_numbers = #tpu.dot_dimension_numbers<[1], [0], [0], [1], [0, 0, 1, 1], [], []>} : vector<8x32xbf16>, vector<32x128xbf16>, vector<8x128xf32> -> vector<8x128xf32>
    %70 = arith.addf %67, %69 : vector<8x128xf32>
    %71 = arith.negf %70 : vector<8x128xf32>
    %72 = math.exp %71 : vector<8x128xf32>
    %cst_23 = arith.constant 1.000000e+00 : f32
    %73 = vector.broadcast %cst_23 : f32 to vector<8x128xf32>
    %74 = arith.addf %73, %72 : vector<8x128xf32>
    %75 = arith.divf %73, %74 : vector<8x128xf32>
    %76 = math.tanh %70 : vector<8x128xf32>
    %77 = vector.extract_strided_slice %75 {offsets = [0, 0], sizes = [8, 32], strides = [1, 1]} : vector<8x128xf32> to vector<8x32xf32>
    %78 = vector.extract_strided_slice %75 {offsets = [0, 32], sizes = [8, 32], strides = [1, 1]} : vector<8x128xf32> to vector<8x32xf32>
    %79 = vector.extract_strided_slice %76 {offsets = [0, 64], sizes = [8, 32], strides = [1, 1]} : vector<8x128xf32> to vector<8x32xf32>
    %80 = vector.extract_strided_slice %75 {offsets = [0, 96], sizes = [8, 32], strides = [1, 1]} : vector<8x128xf32> to vector<8x32xf32>
    %81 = arith.mulf %78, %64 : vector<8x32xf32>
    %82 = arith.mulf %77, %79 : vector<8x32xf32>
    %83 = arith.addf %81, %82 : vector<8x32xf32>
    %84 = math.tanh %83 : vector<8x32xf32>
    %85 = arith.mulf %80, %84 : vector<8x32xf32>
    %c32 = arith.constant 32 : index
    %c0_24 = arith.constant 0 : index
    %86 = vector.load %arg7[%c32, %c0_24] : memref<64x128xf32, #tpu.memory_space<vmem>>, vector<8x128xf32>
    %87 = arith.truncf %85 : vector<8x32xf32> to vector<8x32xbf16>
    %cst_25 = arith.constant dense<0.000000e+00> : vector<8x128xf32>
    %88 = tpu.matmul %87, %7, %cst_25 {dimension_numbers = #tpu.dot_dimension_numbers<[1], [0], [0], [1], [0, 0, 1, 1], [], []>} : vector<8x32xbf16>, vector<32x128xbf16>, vector<8x128xf32> -> vector<8x128xf32>
    %89 = arith.addf %86, %88 : vector<8x128xf32>
    %90 = arith.negf %89 : vector<8x128xf32>
    %91 = math.exp %90 : vector<8x128xf32>
    %cst_26 = arith.constant 1.000000e+00 : f32
    %92 = vector.broadcast %cst_26 : f32 to vector<8x128xf32>
    %93 = arith.addf %92, %91 : vector<8x128xf32>
    %94 = arith.divf %92, %93 : vector<8x128xf32>
    %95 = math.tanh %89 : vector<8x128xf32>
    %96 = vector.extract_strided_slice %94 {offsets = [0, 0], sizes = [8, 32], strides = [1, 1]} : vector<8x128xf32> to vector<8x32xf32>
    %97 = vector.extract_strided_slice %94 {offsets = [0, 32], sizes = [8, 32], strides = [1, 1]} : vector<8x128xf32> to vector<8x32xf32>
    %98 = vector.extract_strided_slice %95 {offsets = [0, 64], sizes = [8, 32], strides = [1, 1]} : vector<8x128xf32> to vector<8x32xf32>
    %99 = vector.extract_strided_slice %94 {offsets = [0, 96], sizes = [8, 32], strides = [1, 1]} : vector<8x128xf32> to vector<8x32xf32>
    %100 = arith.mulf %97, %83 : vector<8x32xf32>
    %101 = arith.mulf %96, %98 : vector<8x32xf32>
    %102 = arith.addf %100, %101 : vector<8x32xf32>
    %103 = math.tanh %102 : vector<8x32xf32>
    %104 = arith.mulf %99, %103 : vector<8x32xf32>
    %c40 = arith.constant 40 : index
    %c0_27 = arith.constant 0 : index
    %105 = vector.load %arg7[%c40, %c0_27] : memref<64x128xf32, #tpu.memory_space<vmem>>, vector<8x128xf32>
    %106 = arith.truncf %104 : vector<8x32xf32> to vector<8x32xbf16>
    %cst_28 = arith.constant dense<0.000000e+00> : vector<8x128xf32>
    %107 = tpu.matmul %106, %7, %cst_28 {dimension_numbers = #tpu.dot_dimension_numbers<[1], [0], [0], [1], [0, 0, 1, 1], [], []>} : vector<8x32xbf16>, vector<32x128xbf16>, vector<8x128xf32> -> vector<8x128xf32>
    %108 = arith.addf %105, %107 : vector<8x128xf32>
    %109 = arith.negf %108 : vector<8x128xf32>
    %110 = math.exp %109 : vector<8x128xf32>
    %cst_29 = arith.constant 1.000000e+00 : f32
    %111 = vector.broadcast %cst_29 : f32 to vector<8x128xf32>
    %112 = arith.addf %111, %110 : vector<8x128xf32>
    %113 = arith.divf %111, %112 : vector<8x128xf32>
    %114 = math.tanh %108 : vector<8x128xf32>
    %115 = vector.extract_strided_slice %113 {offsets = [0, 0], sizes = [8, 32], strides = [1, 1]} : vector<8x128xf32> to vector<8x32xf32>
    %116 = vector.extract_strided_slice %113 {offsets = [0, 32], sizes = [8, 32], strides = [1, 1]} : vector<8x128xf32> to vector<8x32xf32>
    %117 = vector.extract_strided_slice %114 {offsets = [0, 64], sizes = [8, 32], strides = [1, 1]} : vector<8x128xf32> to vector<8x32xf32>
    %118 = vector.extract_strided_slice %113 {offsets = [0, 96], sizes = [8, 32], strides = [1, 1]} : vector<8x128xf32> to vector<8x32xf32>
    %119 = arith.mulf %116, %102 : vector<8x32xf32>
    %120 = arith.mulf %115, %117 : vector<8x32xf32>
    %121 = arith.addf %119, %120 : vector<8x32xf32>
    %122 = math.tanh %121 : vector<8x32xf32>
    %123 = arith.mulf %118, %122 : vector<8x32xf32>
    %c48 = arith.constant 48 : index
    %c0_30 = arith.constant 0 : index
    %124 = vector.load %arg7[%c48, %c0_30] : memref<64x128xf32, #tpu.memory_space<vmem>>, vector<8x128xf32>
    %125 = arith.truncf %123 : vector<8x32xf32> to vector<8x32xbf16>
    %cst_31 = arith.constant dense<0.000000e+00> : vector<8x128xf32>
    %126 = tpu.matmul %125, %7, %cst_31 {dimension_numbers = #tpu.dot_dimension_numbers<[1], [0], [0], [1], [0, 0, 1, 1], [], []>} : vector<8x32xbf16>, vector<32x128xbf16>, vector<8x128xf32> -> vector<8x128xf32>
    %127 = arith.addf %124, %126 : vector<8x128xf32>
    %128 = arith.negf %127 : vector<8x128xf32>
    %129 = math.exp %128 : vector<8x128xf32>
    %cst_32 = arith.constant 1.000000e+00 : f32
    %130 = vector.broadcast %cst_32 : f32 to vector<8x128xf32>
    %131 = arith.addf %130, %129 : vector<8x128xf32>
    %132 = arith.divf %130, %131 : vector<8x128xf32>
    %133 = math.tanh %127 : vector<8x128xf32>
    %134 = vector.extract_strided_slice %132 {offsets = [0, 0], sizes = [8, 32], strides = [1, 1]} : vector<8x128xf32> to vector<8x32xf32>
    %135 = vector.extract_strided_slice %132 {offsets = [0, 32], sizes = [8, 32], strides = [1, 1]} : vector<8x128xf32> to vector<8x32xf32>
    %136 = vector.extract_strided_slice %133 {offsets = [0, 64], sizes = [8, 32], strides = [1, 1]} : vector<8x128xf32> to vector<8x32xf32>
    %137 = vector.extract_strided_slice %132 {offsets = [0, 96], sizes = [8, 32], strides = [1, 1]} : vector<8x128xf32> to vector<8x32xf32>
    %138 = arith.mulf %135, %121 : vector<8x32xf32>
    %139 = arith.mulf %134, %136 : vector<8x32xf32>
    %140 = arith.addf %138, %139 : vector<8x32xf32>
    %141 = math.tanh %140 : vector<8x32xf32>
    %142 = arith.mulf %137, %141 : vector<8x32xf32>
    %c56 = arith.constant 56 : index
    %c0_33 = arith.constant 0 : index
    %143 = vector.load %arg7[%c56, %c0_33] : memref<64x128xf32, #tpu.memory_space<vmem>>, vector<8x128xf32>
    %144 = arith.truncf %142 : vector<8x32xf32> to vector<8x32xbf16>
    %cst_34 = arith.constant dense<0.000000e+00> : vector<8x128xf32>
    %145 = tpu.matmul %144, %7, %cst_34 {dimension_numbers = #tpu.dot_dimension_numbers<[1], [0], [0], [1], [0, 0, 1, 1], [], []>} : vector<8x32xbf16>, vector<32x128xbf16>, vector<8x128xf32> -> vector<8x128xf32>
    %146 = arith.addf %143, %145 : vector<8x128xf32>
    %147 = arith.negf %146 : vector<8x128xf32>
    %148 = math.exp %147 : vector<8x128xf32>
    %cst_35 = arith.constant 1.000000e+00 : f32
    %149 = vector.broadcast %cst_35 : f32 to vector<8x128xf32>
    %150 = arith.addf %149, %148 : vector<8x128xf32>
    %151 = arith.divf %149, %150 : vector<8x128xf32>
    %152 = math.tanh %146 : vector<8x128xf32>
    %153 = vector.extract_strided_slice %151 {offsets = [0, 0], sizes = [8, 32], strides = [1, 1]} : vector<8x128xf32> to vector<8x32xf32>
    %154 = vector.extract_strided_slice %151 {offsets = [0, 32], sizes = [8, 32], strides = [1, 1]} : vector<8x128xf32> to vector<8x32xf32>
    %155 = vector.extract_strided_slice %152 {offsets = [0, 64], sizes = [8, 32], strides = [1, 1]} : vector<8x128xf32> to vector<8x32xf32>
    %156 = vector.extract_strided_slice %151 {offsets = [0, 96], sizes = [8, 32], strides = [1, 1]} : vector<8x128xf32> to vector<8x32xf32>
    %157 = arith.mulf %154, %140 : vector<8x32xf32>
    %158 = arith.mulf %153, %155 : vector<8x32xf32>
    %159 = arith.addf %157, %158 : vector<8x32xf32>
    %160 = math.tanh %159 : vector<8x32xf32>
    %161 = arith.mulf %156, %160 : vector<8x32xf32>
    %c0_36 = arith.constant 0 : index
    %c0_37 = arith.constant 0 : index
    %162 = vector.load %arg4[%c0_36, %c0_37] : memref<1x32xf32, #tpu.memory_space<vmem>>, vector<1x32xf32>
    %163 = vector.broadcast %162 : vector<1x32xf32> to vector<8x32xf32>
    %164 = arith.mulf %161, %163 : vector<8x32xf32>
    %cst_38 = arith.constant dense<0.000000e+00> : vector<8xf32>
    %165 = vector.multi_reduction <add>, %164, %cst_38 [1] : vector<8x32xf32> to vector<8xf32>
    %166 = vector.shape_cast %165 : vector<8xf32> to vector<8x1xf32>
    %c0_39 = arith.constant 0 : index
    %c0_40 = arith.constant 0 : index
    %167 = memref.load %arg5[%c0_39, %c0_40] : memref<1x1xf32, #tpu.memory_space<smem>>
    %168 = vector.broadcast %167 : f32 to vector<8x1xf32>
    %169 = arith.addf %166, %168 : vector<8x1xf32>
    %c0_41 = arith.constant 0 : index
    %c0_42 = arith.constant 0 : index
    %170 = vector.load %arg6[%c0_41, %c0_42] : memref<8x1xf32, #tpu.memory_space<vmem>>, vector<8x1xf32>
    tpu.vector_store %arg6[%c0_41, %c0_42], %169 {strides = array<i32>} : memref<8x1xf32, #tpu.memory_space<vmem>>, vector<8x1xf32>,
    return
  }
}

</mosaic_0001>

<bundles_post_ra>
// kernel: model_forward.1
= control target key start
LH: loop header
LB: loop body
LE: loop exit
PB: predicated region body
PF: predicated region fallthrough
CT: control target
= control target key end

     0   :  { %vm71_vm0 = vcmask 1041408   ;;  %vm58_vm1 = vcmask 31744   ;;  %v739_v5 = vmov 0   ;;  %s740_s29 = smov 64   ;;  %vm129_vm6 = vcmask 261120   ;;  %s742_s13 = smov 96   ;;  %s885_s1 = inlined_call_operand.vmem [shape: bf16[4,128], index: 1, kind: input, shape index: {}]   ;;  %s886_s2 = inlined_call_operand.vmem [shape: bf16[32,128], index: 2, kind: input, shape index: {}]   ;;  %s887_s0 = inlined_call_operand.vmem [shape: bf16[64,4], index: 0, kind: input, shape index: {}]   ;;  %s888_s3 = inlined_call_operand.vmem [shape: f32[1,128], index: 3, kind: input, shape index: {}]   ;;  %s889_s4 = inlined_call_operand.vmem [shape: f32[1,32], index: 4, kind: input, shape index: {}]   ;;  %s890_s5 = inlined_call_operand.<no memory space> [shape: f32[1,1], index: 5, kind: input, shape index: {}]   ;;  %s891_s6 = inlined_call_operand.vmem [shape: f32[8,1], index: 6, kind: output, shape index: {}]  }
   0x1   :  { %v33_v0 = vld [vmem:[%s885_s1] sm:$0x3]  ;;  %v784_v1 = vld [vmem:[%s886_s2 + $0x8] sm:$0xff] }
   0x2   :  { %v73_v2 = vsel %vm71_vm0, %v33_v0, 0  ;;  %v663_v3 = vld [vmem:[%s887_s0] sm:$0xff]  ;;  %139 = vmatpush.bf16.msra.mxu1 %v784_v1  ;;  %198 = vmatpush.bf16.msra.mxu2 %v784_v1  ;;  %v664_v61 = vld [vmem:[%s887_s0 + $0x8] sm:$0xff] }
   0x3   :  { %82 = vmatpush.bf16.msra.mxu0 %v73_v2  ;;  %v793_v4 = vld [vmem:[%s886_s2] sm:$0xff]  ;;  %257 = vmatpush.bf16.msra.mxu3 %v784_v1 }
   0x4   :  { %v812_v6 = vld [vmem:[%s888_s3] ss:$0 sm:$0xff]  ;;  %s741_s3 = smov 32  }
   0x6   :  { %636 = vmatmul.msk.bf16.vlgmr.msra.gmra.mxu0 %vm58_vm1, %v663_v3  ;;  %140 = vmatpush.bf16.msra.mxu1 %v793_v4 }
   0x7   :  { %199 = vmatpush.bf16.msra.mxu2 %v793_v4  ;;  %258 = vmatpush.bf16.msra.mxu3 %v793_v4 }
   0x9   :  { %141 = vmatmul.bf16.vlgmr.msra.gmra.mxu1 %v739_v5 }
   0xa   :  { %316 = vmatpush.bf16.msrb.mxu1 %v784_v1 }
   0xb   :  { %375 = vmatpush.bf16.msrb.mxu2 %v784_v1  ;;  %434 = vmatpush.bf16.msrb.mxu3 %v784_v1 }
   0xe   :  { %317 = vmatpush.bf16.msrb.mxu1 %v793_v4 }
   0xf   :  { %376 = vmatpush.bf16.msrb.mxu2 %v793_v4  ;;  %435 = vmatpush.bf16.msrb.mxu3 %v793_v4 }
  0x12   :  { %493 = vmatpush.bf16.msra.mxu1 %v784_v1 }
  0x16   :  { %494 = vmatpush.bf16.msra.mxu1 %v793_v4  ;;  %637 = vmatmul.msk.bf16.gmra.mxu0 %vm58_vm1, %v664_v61 }
  0x83   :  { %v84_v7 = vpop.f32.mrf.mxu0 }
  0x84   :  { %v85_v8 = vadd.f32 %v812_v6, %v84_v7 }
  0x86   :  { %v142_v9 = vpop.f32.mrf.mxu1 }
  0x87   :  { %v146_v10 = vadd.f32 %v142_v9, %v85_v8 }
  0x89   :  { %675 = vtanh.f32 %v146_v10  ;;  %v648_v13 = vmul.f32 -1.442695, %v146_v10 }
  0x8b   :  { %677 = vpow2.f32 %v648_v13  ;;  %v86_v36 = vpop.f32.mrf.mxu0 }
  0x8c   :  { %v87_v37 = vadd.f32 %v812_v6, %v86_v36 }
  0x8e   :  { %v144_v11 = vpop.f32.mrf.mxu1 }
  0x8f   :  { %v676_v12 = vpop.eup %675 }
  0x90   :  { %169 = vrot.lane.b32.xlu0 %v676_v12, %s740_s29 }
  0x91   :  { %v678_v14 = vpop.eup %677 }
  0x92   :  { %v150_v15 = vadd.f32 1.0, %v678_v14 }
  0x93   :  { %v89_v2 = vpop.f32.mrf.mxu0 }
  0x94   :  { %679 = vrcp.f32 %v150_v15  ;;  %v162_v21 = vand.u32 2147483648, %v150_v15  ;;  %vm156_vm3 = vweird.f32 %v150_v15  ;;  %v160_v22 = vand.u32 2147483647, %v150_v15 }
  0x95   :  { %v90_v3 = vadd.f32 %v812_v6, %v89_v2 }
  0x96   :  { %v163_v24 = vor.u32 1.1754944e-38, %v162_v21  ;;  %vm161_vm5 = vcmp.eq.f32.partialorder %v160_v22, 8.507059e+37 }
  0x9a   :  { %v680_v16 = vpop.eup %679 }
  0x9b   :  { %v152_v17 = vmul.f32 %v680_v16, %v150_v15  ;;  %vm157_vm2 = vweird.f32 %v680_v16 }
  0x9c   :  { %vm158_vm4 = vmor %vm156_vm3, %vm157_vm2 }
  0x9d   :  { %v153_v18 = vsub.f32 1.0, %v152_v17 }
  0x9f   :  { %v154_v19 = vmul.f32 %v680_v16, %v153_v18 }
  0xa1   :  { %v155_v20 = vadd.f32 %v680_v16, %v154_v19 }
  0xa3   :  { %v159_v23 = vsel %vm158_vm4, %v680_v16, %v155_v20 }
  0xa4   :  { %v164_v26 = vsel %vm161_vm5, %v163_v24, %v159_v23 }
  0xa5   :  { %v167_v28 = vmul.f32 0.0, %v164_v26 }
 0x102   :  { %v170_v25 = vpop.permute.xlu0 %169 }
 0x103   :  { %v172_v27 = vmul.f32 %v170_v25, %v164_v26 }
 0x105   :  { %174 = vrot.lane.b32.xlu0 %v172_v27, %s741_s3 }
 0x177   :  { %v175_v29 = vpop.permute.xlu0 %174 }
 0x178   :  { %v177_v30 = vadd.f32 %v175_v29, %v167_v28 }
 0x17a   :  { %681 = vtanh.f32 %v177_v30 }
 0x180   :  { %v682_v31 = vpop.eup %681 }
 0x181   :  { %180 = vrot.lane.b32.xlu1 %v682_v31, %s740_s29 }
 0x1f3   :  { %v181_v32 = vpop.permute.xlu1 %180 }
 0x1f4   :  { %v183_v33 = vmul.f32 %v181_v32, %v164_v26  ;;  %v91_v32 = vpop.f32.mrf.mxu0 }
 0x1f6   :  { %v185_v34 = vpack.c.bf16 %v183_v33, %v183_v33  ;;  %v92_v33 = vadd.f32 %v812_v6, %v91_v32 }
 0x1f8   :  { %187 = vrot.lane.b32.xlu1 %v185_v34, %s741_s3 }
 0x26a   :  { %v188_v35 = vpop.permute.xlu1 %187 }
 0x26b   :  { %649 = vmatmul.msk.bf16.vlgmr.msra.gmra.mxu2 %vm129_vm6, %v188_v35 }
 0x26c   :  { %552 = vmatpush.bf16.msra.mxu2 %v784_v1 }
 0x270   :  { %553 = vmatpush.bf16.msra.mxu2 %v793_v4 }
 0x2ee   :  { %v201_v38 = vpop.f32.mrf.mxu2 }
 0x2ef   :  { %v205_v39 = vadd.f32 %v201_v38, %v87_v37 }
 0x2f1   :  { %683 = vtanh.f32 %v205_v39  ;;  %v650_v42 = vmul.f32 -1.442695, %v205_v39 }
 0x2f3   :  { %685 = vpow2.f32 %v650_v42 }
 0x2f6   :  { %v203_v40 = vpop.f32.mrf.mxu2 }
 0x2f7   :  { %v684_v41 = vpop.eup %683 }
 0x2f8   :  { %228 = vrot.lane.b32.xlu2 %v684_v41, %s740_s29 }
 0x2f9   :  { %v686_v43 = vpop.eup %685 }
 0x2fa   :  { %v209_v44 = vadd.f32 1.0, %v686_v43 }
 0x2fc   :  { %687 = vrcp.f32 %v209_v44  ;;  %v221_v50 = vand.u32 2147483648, %v209_v44  ;;  %vm215_vm8 = vweird.f32 %v209_v44  ;;  %v219_v51 = vand.u32 2147483647, %v209_v44 }
 0x2fe   :  { %v222_v53 = vor.u32 1.1754944e-38, %v221_v50  ;;  %vm220_vm10 = vcmp.eq.f32.partialorder %v219_v51, 8.507059e+37 }
 0x302   :  { %v688_v45 = vpop.eup %687 }
 0x303   :  { %v211_v46 = vmul.f32 %v688_v45, %v209_v44  ;;  %vm216_vm7 = vweird.f32 %v688_v45 }
 0x304   :  { %vm217_vm9 = vmor %vm215_vm8, %vm216_vm7 }
 0x305   :  { %v212_v47 = vsub.f32 1.0, %v211_v46 }
 0x307   :  { %v213_v48 = vmul.f32 %v688_v45, %v212_v47 }
 0x309   :  { %v214_v49 = vadd.f32 %v688_v45, %v213_v48 }
 0x30b   :  { %v218_v52 = vsel %vm217_vm9, %v688_v45, %v214_v49 }
 0x30c   :  { %v223_v55 = vsel %vm220_vm10, %v222_v53, %v218_v52 }
 0x30d   :  { %v226_v57 = vmul.f32 %v223_v55, %v177_v30 }
 0x352   :  { %v229_v54 = vpop.permute.xlu2 %228 }
 0x353   :  { %v231_v56 = vmul.f32 %v229_v54, %v223_v55 }
 0x355   :  { %233 = vrot.lane.b32.xlu2 %v231_v56, %s741_s3 }
 0x3af   :  { %v234_v58 = vpop.permute.xlu2 %233 }
 0x3b0   :  { %v236_v59 = vadd.f32 %v234_v58, %v226_v57  ;;  %v665_v57 = vld [vmem:[%s887_s0 + $0x10] sm:$0xff] }
 0x3b1   :  { %638 = vmatmul.msk.bf16.gmra.mxu0 %vm58_vm1, %v665_v57 }
 0x3b2   :  { %689 = vtanh.f32 %v236_v59 }
 0x3b8   :  { %v690_v60 = vpop.eup %689 }
 0x3b9   :  { %239 = vrot.lane.b32.xlu0 %v690_v60, %s740_s29 }
 0x42b   :  { %v240_v62 = vpop.permute.xlu0 %239 }
 0x42c   :  { %v242_v63 = vmul.f32 %v240_v62, %v223_v55 }
 0x42e   :  { %v244_v0 = vpack.c.bf16 %v242_v63, %v242_v63  ;;  %v94_v62 = vpop.f32.mrf.mxu0 }
 0x42f   :  { %v95_v63 = vadd.f32 %v812_v6, %v94_v62 }
 0x430   :  { %246 = vrot.lane.b32.xlu1 %v244_v0, %s741_s3 }
 0x4a2   :  { %v247_v1 = vpop.permute.xlu1 %246 }
 0x4a3   :  { %651 = vmatmul.msk.bf16.vlgmr.msra.gmra.mxu3 %vm129_vm6, %v247_v1 }
 0x526   :  { %v260_v4 = vpop.f32.mrf.mxu3 }
 0x527   :  { %v264_v5 = vadd.f32 %v260_v4, %v90_v3 }
 0x529   :  { %691 = vtanh.f32 %v264_v5  ;;  %v652_v9 = vmul.f32 -1.442695, %v264_v5 }
 0x52b   :  { %693 = vpow2.f32 %v652_v9 }
 0x52e   :  { %v262_v7 = vpop.f32.mrf.mxu3 }
 0x52f   :  { %v692_v8 = vpop.eup %691 }
 0x530   :  { %287 = vrot.lane.b32.xlu2 %v692_v8, %s740_s29 }
 0x531   :  { %v694_v10 = vpop.eup %693 }
 0x532   :  { %v268_v11 = vadd.f32 1.0, %v694_v10 }
 0x534   :  { %695 = vrcp.f32 %v268_v11  ;;  %v280_v17 = vand.u32 2147483648, %v268_v11  ;;  %vm274_vm12 = vweird.f32 %v268_v11  ;;  %v278_v18 = vand.u32 2147483647, %v268_v11 }
 0x536   :  { %v281_v20 = vor.u32 1.1754944e-38, %v280_v17  ;;  %vm279_vm14 = vcmp.eq.f32.partialorder %v278_v18, 8.507059e+37 }
 0x53a   :  { %v696_v12 = vpop.eup %695 }
 0x53b   :  { %v270_v13 = vmul.f32 %v696_v12, %v268_v11  ;;  %vm275_vm11 = vweird.f32 %v696_v12 }
 0x53c   :  { %vm276_vm13 = vmor %vm274_vm12, %vm275_vm11 }
 0x53d   :  { %v271_v14 = vsub.f32 1.0, %v270_v13 }
 0x53f   :  { %v272_v15 = vmul.f32 %v696_v12, %v271_v14 }
 0x541   :  { %v273_v16 = vadd.f32 %v696_v12, %v272_v15 }
 0x543   :  { %v277_v19 = vsel %vm276_vm13, %v696_v12, %v273_v16 }
 0x544   :  { %v282_v22 = vsel %vm279_vm14, %v281_v20, %v277_v19 }
 0x545   :  { %v285_v24 = vmul.f32 %v282_v22, %v236_v59 }
 0x58a   :  { %v288_v21 = vpop.permute.xlu2 %287 }
 0x58b   :  { %v290_v23 = vmul.f32 %v288_v21, %v282_v22 }
 0x58d   :  { %292 = vrot.lane.b32.xlu0 %v290_v23, %s741_s3 }
 0x5ff   :  { %v293_v25 = vpop.permute.xlu0 %292 }
 0x600   :  { %v295_v26 = vadd.f32 %v293_v25, %v285_v24 }
 0x602   :  { %697 = vtanh.f32 %v295_v26 }
 0x608   :  { %v698_v27 = vpop.eup %697 }
 0x609   :  { %298 = vrot.lane.b32.xlu1 %v698_v27, %s740_s29 }
 0x67b   :  { %v299_v28 = vpop.permute.xlu1 %298 }
 0x67c   :  { %v301_v29 = vmul.f32 %v299_v28, %v282_v22  ;;  %v96_v28 = vpop.f32.mrf.mxu0 }
 0x67e   :  { %v303_v30 = vpack.c.bf16 %v301_v29, %v301_v29  ;;  %v97_v29 = vadd.f32 %v812_v6, %v96_v28 }
 0x680   :  { %305 = vrot.lane.b32.xlu2 %v303_v30, %s741_s3 }
 0x6da   :  { %v306_v31 = vpop.permute.xlu2 %305 }
 0x6db   :  { %653 = vmatmul.msk.bf16.vlgmr.msrb.gmra.mxu1 %vm129_vm6, %v306_v31 }
 0x758   :  { %v319_v34 = vpop.f32.mrf.mxu1 }
 0x759   :  { %v323_v35 = vadd.f32 %v319_v34, %v92_v33 }
 0x75b   :  { %699 = vtanh.f32 %v323_v35  ;;  %v654_v38 = vmul.f32 -1.442695, %v323_v35 }
 0x75d   :  { %701 = vpow2.f32 %v654_v38 }
 0x760   :  { %v321_v36 = vpop.f32.mrf.mxu1 }
 0x761   :  { %v700_v37 = vpop.eup %699 }
 0x762   :  { %346 = vrot.lane.b32.xlu0 %v700_v37, %s740_s29 }
 0x763   :  { %v702_v39 = vpop.eup %701 }
 0x764   :  { %v327_v40 = vadd.f32 1.0, %v702_v39 }
 0x766   :  { %703 = vrcp.f32 %v327_v40  ;;  %v339_v46 = vand.u32 2147483648, %v327_v40  ;;  %vm333_vm0 = vweird.f32 %v327_v40  ;;  %v337_v47 = vand.u32 2147483647, %v327_v40 }
 0x768   :  { %v340_v49 = vor.u32 1.1754944e-38, %v339_v46  ;;  %vm338_vm3 = vcmp.eq.f32.partialorder %v337_v47, 8.507059e+37 }
 0x76c   :  { %v704_v41 = vpop.eup %703 }
 0x76d   :  { %v329_v42 = vmul.f32 %v704_v41, %v327_v40  ;;  %vm334_vm15 = vweird.f32 %v704_v41 }
 0x76e   :  { %vm335_vm2 = vmor %vm333_vm0, %vm334_vm15 }
 0x76f   :  { %v330_v43 = vsub.f32 1.0, %v329_v42 }
 0x771   :  { %v331_v44 = vmul.f32 %v704_v41, %v330_v43 }
 0x773   :  { %v332_v45 = vadd.f32 %v704_v41, %v331_v44 }
 0x775   :  { %v336_v48 = vsel %vm335_vm2, %v704_v41, %v332_v45 }
 0x776   :  { %v341_v51 = vsel %vm338_vm3, %v340_v49, %v336_v48 }
 0x777   :  { %v344_v53 = vmul.f32 %v341_v51, %v295_v26 }
 0x7d4   :  { %v347_v50 = vpop.permute.xlu0 %346 }
 0x7d5   :  { %v349_v52 = vmul.f32 %v347_v50, %v341_v51 }
 0x7d7   :  { %351 = vrot.lane.b32.xlu1 %v349_v52, %s741_s3 }
 0x849   :  { %v352_v54 = vpop.permute.xlu1 %351 }
 0x84a   :  { %v354_v55 = vadd.f32 %v352_v54, %v344_v53  ;;  %v666_v53 = vld [vmem:[%s887_s0 + $0x18] sm:$0xff] }
 0x84b   :  { %639 = vmatmul.msk.bf16.gmra.mxu0 %vm58_vm1, %v666_v53 }
 0x84c   :  { %705 = vtanh.f32 %v354_v55 }
 0x852   :  { %v706_v56 = vpop.eup %705 }
 0x853   :  { %357 = vrot.lane.b32.xlu2 %v706_v56, %s740_s29 }
 0x8ad   :  { %v358_v58 = vpop.permute.xlu2 %357 }
 0x8ae   :  { %v360_v59 = vmul.f32 %v358_v58, %v341_v51 }
 0x8b0   :  { %v362_v60 = vpack.c.bf16 %v360_v59, %v360_v59 }
 0x8b2   :  { %364 = vrot.lane.b32.xlu0 %v362_v60, %s741_s3 }
 0x8c8   :  { %v99_v58 = vpop.f32.mrf.mxu0 }
 0x8c9   :  { %v100_v59 = vadd.f32 %v812_v6, %v99_v58 }
 0x924   :  { %v365_v61 = vpop.permute.xlu0 %364 }
 0x925   :  { %655 = vmatmul.msk.bf16.vlgmr.msrb.gmra.mxu2 %vm129_vm6, %v365_v61 }
 0x9a8   :  { %v378_v0 = vpop.f32.mrf.mxu2 }
 0x9a9   :  { %v382_v1 = vadd.f32 %v378_v0, %v95_v63 }
 0x9ab   :  { %707 = vtanh.f32 %v382_v1  ;;  %v656_v4 = vmul.f32 -1.442695, %v382_v1 }
 0x9ad   :  { %709 = vpow2.f32 %v656_v4 }
 0x9b0   :  { %v380_v2 = vpop.f32.mrf.mxu2 }
 0x9b1   :  { %v708_v3 = vpop.eup %707 }
 0x9b2   :  { %405 = vrot.lane.b32.xlu1 %v708_v3, %s740_s29 }
 0x9b3   :  { %v710_v5 = vpop.eup %709 }
 0x9b4   :  { %v386_v7 = vadd.f32 1.0, %v710_v5 }
 0x9b6   :  { %711 = vrcp.f32 %v386_v7  ;;  %v398_v13 = vand.u32 2147483648, %v386_v7  ;;  %vm392_vm5 = vweird.f32 %v386_v7  ;;  %v396_v14 = vand.u32 2147483647, %v386_v7 }
 0x9b8   :  { %v399_v16 = vor.u32 1.1754944e-38, %v398_v13  ;;  %vm397_vm8 = vcmp.eq.f32.partialorder %v396_v14, 8.507059e+37 }
 0x9bc   :  { %v712_v8 = vpop.eup %711 }
 0x9bd   :  { %v388_v9 = vmul.f32 %v712_v8, %v386_v7  ;;  %vm393_vm4 = vweird.f32 %v712_v8 }
 0x9be   :  { %vm394_vm7 = vmor %vm392_vm5, %vm393_vm4  ;;  %vm614_vm5 = vcmask 7168  }
 0x9bf   :  { %v389_v10 = vsub.f32 1.0, %v388_v9 }
 0x9c1   :  { %v390_v11 = vmul.f32 %v712_v8, %v389_v10 }
 0x9c3   :  { %v391_v12 = vadd.f32 %v712_v8, %v390_v11 }
 0x9c5   :  { %v395_v15 = vsel %vm394_vm7, %v712_v8, %v391_v12 }
 0x9c6   :  { %v400_v18 = vsel %vm397_vm8, %v399_v16, %v395_v15 }
 0x9c7   :  { %v403_v20 = vmul.f32 %v400_v18, %v354_v55 }
 0xa24   :  { %v406_v17 = vpop.permute.xlu1 %405 }
 0xa25   :  { %v408_v19 = vmul.f32 %v406_v17, %v400_v18 }
 0xa27   :  { %410 = vrot.lane.b32.xlu2 %v408_v19, %s741_s3 }
 0xa81   :  { %v411_v21 = vpop.permute.xlu2 %410 }
 0xa82   :  { %v413_v22 = vadd.f32 %v411_v21, %v403_v20 }
 0xa84   :  { %713 = vtanh.f32 %v413_v22 }
 0xa8a   :  { %v714_v23 = vpop.eup %713 }
 0xa8b   :  { %416 = vrot.lane.b32.xlu0 %v714_v23, %s740_s29 }
 0xafd   :  { %v417_v24 = vpop.permute.xlu0 %416 }
 0xafe   :  { %v419_v25 = vmul.f32 %v417_v24, %v400_v18  ;;  %v101_v24 = vpop.f32.mrf.mxu0 }
 0xb00   :  { %v421_v26 = vpack.c.bf16 %v419_v25, %v419_v25  ;;  %v102_v25 = vadd.f32 %v812_v6, %v101_v24 }
 0xb02   :  { %423 = vrot.lane.b32.xlu1 %v421_v26, %s741_s3 }
 0xb74   :  { %v424_v27 = vpop.permute.xlu1 %423 }
 0xb75   :  { %657 = vmatmul.msk.bf16.vlgmr.msrb.gmra.mxu3 %vm129_vm6, %v424_v27 }
 0xbf8   :  { %v437_v30 = vpop.f32.mrf.mxu3 }
 0xbf9   :  { %v441_v31 = vadd.f32 %v437_v30, %v97_v29 }
 0xbfb   :  { %715 = vtanh.f32 %v441_v31  ;;  %v658_v34 = vmul.f32 -1.442695, %v441_v31 }
 0xbfd   :  { %717 = vpow2.f32 %v658_v34 }
 0xc00   :  { %v439_v32 = vpop.f32.mrf.mxu3 }
 0xc01   :  { %v716_v33 = vpop.eup %715 }
 0xc02   :  { %464 = vrot.lane.b32.xlu2 %v716_v33, %s740_s29 }
 0xc03   :  { %v718_v35 = vpop.eup %717 }
 0xc04   :  { %v445_v36 = vadd.f32 1.0, %v718_v35 }
 0xc06   :  { %719 = vrcp.f32 %v445_v36  ;;  %v457_v42 = vand.u32 2147483648, %v445_v36  ;;  %vm451_vm10 = vweird.f32 %v445_v36  ;;  %v455_v43 = vand.u32 2147483647, %v445_v36 }
 0xc08   :  { %v458_v45 = vor.u32 1.1754944e-38, %v457_v42  ;;  %vm456_vm12 = vcmp.eq.f32.partialorder %v455_v43, 8.507059e+37 }
 0xc0c   :  { %v720_v37 = vpop.eup %719 }
 0xc0d   :  { %v447_v38 = vmul.f32 %v720_v37, %v445_v36  ;;  %vm452_vm9 = vweird.f32 %v720_v37 }
 0xc0e   :  { %vm453_vm11 = vmor %vm451_vm10, %vm452_vm9 }
 0xc0f   :  { %v448_v39 = vsub.f32 1.0, %v447_v38 }
 0xc11   :  { %v449_v40 = vmul.f32 %v720_v37, %v448_v39 }
 0xc13   :  { %v450_v41 = vadd.f32 %v720_v37, %v449_v40 }
 0xc15   :  { %v454_v44 = vsel %vm453_vm11, %v720_v37, %v450_v41 }
 0xc16   :  { %v459_v47 = vsel %vm456_vm12, %v458_v45, %v454_v44  ;;  %v674_v44 = vld [vmem:[%s889_s4] ss:$0 sm:$0xff] }
 0xc17   :  { %v462_v49 = vmul.f32 %v459_v47, %v413_v22 }
 0xc5c   :  { %v465_v46 = vpop.permute.xlu2 %464 }
 0xc5d   :  { %v467_v48 = vmul.f32 %v465_v46, %v459_v47 }
 0xc5f   :  { %469 = vrot.lane.b32.xlu0 %v467_v48, %s741_s3 }
 0xcd1   :  { %v470_v50 = vpop.permute.xlu0 %469 }
 0xcd2   :  { %v472_v51 = vadd.f32 %v470_v50, %v462_v49 }
 0xcd4   :  { %721 = vtanh.f32 %v472_v51 }
 0xcda   :  { %v722_v52 = vpop.eup %721 }
 0xcdb   :  { %475 = vrot.lane.b32.xlu1 %v722_v52, %s740_s29 }
 0xd4d   :  { %v476_v54 = vpop.permute.xlu1 %475 }
 0xd4e   :  { %v478_v55 = vmul.f32 %v476_v54, %v459_v47 }
 0xd50   :  { %v480_v56 = vpack.c.bf16 %v478_v55, %v478_v55  ;;  %v612_v55 = vstv %s890_s5 }
 0xd52   :  { %482 = vrot.lane.b32.xlu2 %v480_v56, %s741_s3 }
 0xdac   :  { %v483_v57 = vpop.permute.xlu2 %482 }
 0xdad   :  { %659 = vmatmul.msk.bf16.vlgmr.msra.gmra.mxu1 %vm129_vm6, %v483_v57 }
 0xe2a   :  { %v496_v60 = vpop.f32.mrf.mxu1 }
 0xe2b   :  { %v500_v61 = vadd.f32 %v496_v60, %v100_v59 }
 0xe2d   :  { %723 = vtanh.f32 %v500_v61  ;;  %v660_v0 = vmul.f32 -1.442695, %v500_v61 }
 0xe2f   :  { %725 = vpow2.f32 %v660_v0 }
 0xe32   :  { %v498_v62 = vpop.f32.mrf.mxu1 }
 0xe33   :  { %v724_v63 = vpop.eup %723 }
 0xe34   :  { %523 = vrot.lane.b32.xlu0 %v724_v63, %s740_s29 }
 0xe35   :  { %v726_v1 = vpop.eup %725 }
 0xe36   :  { %v504_v2 = vadd.f32 1.0, %v726_v1 }
 0xe38   :  { %727 = vrcp.f32 %v504_v2  ;;  %v516_v9 = vand.u32 2147483648, %v504_v2  ;;  %vm510_vm13 = vweird.f32 %v504_v2  ;;  %v514_v10 = vand.u32 2147483647, %v504_v2 }
 0xe3a   :  { %v517_v12 = vor.u32 1.1754944e-38, %v516_v9  ;;  %vm515_vm15 = vcmp.eq.f32.partialorder %v514_v10, 8.507059e+37 }
 0xe3e   :  { %v728_v3 = vpop.eup %727 }
 0xe3f   :  { %v506_v4 = vmul.f32 %v728_v3, %v504_v2  ;;  %vm511_vm1 = vweird.f32 %v728_v3 }
 0xe40   :  { %vm512_vm14 = vmor %vm510_vm13, %vm511_vm1 }
 0xe41   :  { %v507_v5 = vsub.f32 1.0, %v506_v4 }
 0xe43   :  { %v508_v7 = vmul.f32 %v728_v3, %v507_v5 }
 0xe45   :  { %v509_v8 = vadd.f32 %v728_v3, %v508_v7 }
 0xe47   :  { %v513_v11 = vsel %vm512_vm14, %v728_v3, %v509_v8 }
 0xe48   :  { %v518_v14 = vsel %vm515_vm15, %v517_v12, %v513_v11 }
 0xe49   :  { %v521_v16 = vmul.f32 %v518_v14, %v472_v51 }
 0xea6   :  { %v524_v13 = vpop.permute.xlu0 %523 }
 0xea7   :  { %v526_v15 = vmul.f32 %v524_v13, %v518_v14 }
 0xea9   :  { %528 = vrot.lane.b32.xlu1 %v526_v15, %s741_s3 }
 0xf1b   :  { %v529_v17 = vpop.permute.xlu1 %528 }
 0xf1c   :  { %v531_v18 = vadd.f32 %v529_v17, %v521_v16 }
 0xf1e   :  { %729 = vtanh.f32 %v531_v18 }
 0xf24   :  { %v730_v19 = vpop.eup %729 }
 0xf25   :  { %534 = vrot.lane.b32.xlu2 %v730_v19, %s740_s29 }
 0xf7f   :  { %v535_v20 = vpop.permute.xlu2 %534 }
 0xf80   :  { %v537_v21 = vmul.f32 %v535_v20, %v518_v14 }
 0xf82   :  { %v539_v22 = vpack.c.bf16 %v537_v21, %v537_v21 }
 0xf84   :  { %541 = vrot.lane.b32.xlu0 %v539_v22, %s741_s3 }
 0xff6   :  { %v542_v23 = vpop.permute.xlu0 %541 }
 0xff7   :  { %661 = vmatmul.msk.bf16.vlgmr.msra.gmra.mxu2 %vm129_vm6, %v542_v23 }
0x107a   :  { %v555_v26 = vpop.f32.mrf.mxu2 }
0x107b   :  { %v559_v27 = vadd.f32 %v555_v26, %v102_v25 }
0x107d   :  { %731 = vtanh.f32 %v559_v27  ;;  %v662_v30 = vmul.f32 -1.442695, %v559_v27 }
0x107f   :  { %733 = vpow2.f32 %v662_v30 }
0x1082   :  { %v557_v28 = vpop.f32.mrf.mxu2 }
0x1083   :  { %v732_v29 = vpop.eup %731 }
0x1084   :  { %582 = vrot.lane.b32.xlu1 %v732_v29, %s740_s29 }
0x1085   :  { %v734_v31 = vpop.eup %733 }
0x1086   :  { %v563_v32 = vadd.f32 1.0, %v734_v31 }
0x1088   :  { %735 = vrcp.f32 %v563_v32  ;;  %v575_v38 = vand.u32 2147483648, %v563_v32  ;;  %vm569_vm2 = vweird.f32 %v563_v32  ;;  %v573_v6 = vand.u32 2147483647, %v563_v32 }
0x108a   :  { %v576_v40 = vor.u32 1.1754944e-38, %v575_v38  ;;  %vm574_vm4 = vcmp.eq.f32.partialorder %v573_v6, 8.507059e+37 }
0x108c   :  { %600 = vrot.lane.b32.xlu1 %v674_v44, %s742_s13 }
0x108e   :  { %v736_v33 = vpop.eup %735 }
0x108f   :  { %v565_v34 = vmul.f32 %v736_v33, %v563_v32  ;;  %vm570_vm0 = vweird.f32 %v736_v33 }
0x1090   :  { %vm571_vm3 = vmor %vm569_vm2, %vm570_vm0 }
0x1091   :  { %v566_v35 = vsub.f32 1.0, %v565_v34 }
0x1093   :  { %v567_v36 = vmul.f32 %v736_v33, %v566_v35 }
0x1095   :  { %v568_v37 = vadd.f32 %v736_v33, %v567_v36 }
0x1097   :  { %v572_v39 = vsel %vm571_vm3, %v736_v33, %v568_v37 }
0x1098   :  { %v577_v42 = vsel %vm574_vm4, %v576_v40, %v572_v39 }
0x1099   :  { %v580_v45 = vmul.f32 %v577_v42, %v531_v18 }
0x10f6   :  { %v583_v41 = vpop.permute.xlu1 %582 }
0x10f7   :  { %v585_v43 = vmul.f32 %v583_v41, %v577_v42 }
0x10f9   :  { %587 = vrot.lane.b32.xlu2 %v585_v43, %s741_s3 }
0x10fe   :  { %v601_v50 = vpop.permute.xlu1 %600 }
0x1153   :  { %v588_v46 = vpop.permute.xlu2 %587 }
0x1154   :  { %v590_v47 = vadd.f32 %v588_v46, %v580_v45 }
0x1156   :  { %737 = vtanh.f32 %v590_v47 }
0x115c   :  { %v738_v48 = vpop.eup %737 }
0x115d   :  { %593 = vrot.lane.b32.xlu0 %v738_v48, %s740_s29 }
0x11cf   :  { %v594_v49 = vpop.permute.xlu0 %593 }
0x11d0   :  { %v596_v51 = vmul.f32 %v594_v49, %v577_v42 }
0x11d2   :  { %v603_v52 = vmul.f32 %v601_v50, %v596_v51 }
0x11d4   :  { %605 = vrot.lane.b32.xlu2 %v603_v52, %s741_s3 }
0x122e   :  { %v606_v53 = vpop.permute.xlu2 %605 }
0x122f   :  { %v608_v54 = vsel %vm129_vm6, %v606_v53, 0.0 }
0x1230   :  { %609 = vadd.xlane.f32.xlu0 %v608_v54 }
0x12a3   :  { %v610_v56 = vpop.xlane.xlu0 %609 }
0x12a4   :  { %v613_v57 = vadd.f32 %v612_v55, %v610_v56 }
0x12a6   :  { %615 = vst.msk [vmem:[%s891_s6] sm:$0xff] %vm614_vm5, %v613_v57 }

</bundles_post_ra>
